<compile_context>
chip_gen: v7x
topology: tpu7x:2x2x1
jax: 0.10.0
libtpu: 0.0.40
codegen_flags: <defaults>
</compile_context>

<pallas_src>
import jax
import jax.numpy as jnp
from jax.experimental import pallas as pl
from jax.experimental.pallas import tpu as pltpu

_IN = 784      # 1*28*28
_H = 128       # hidden width
_N_OUT = 100   # true output width
_N_PAD = 128   # lane-dense padded output width


def _round_up(x, m):
    return ((x + m - 1) // m) * m


def _mlp_kernel(x_ref, w1_ref, b1_ref, w2_ref, b2_ref, o_ref):
    # x_ref : (TB, 784)   w1_ref : (784, 128)  b1_ref : (1, 128)
    # w2_ref: (128, 128)  b2_ref : (1, 128)    o_ref  : (TB, 128)
    x = x_ref[...]
    # Linear(784 -> 128) + ReLU   (MXU matmul, f32 accumulation)
    h = jnp.dot(x, w1_ref[...], preferred_element_type=jnp.float32) + b1_ref[...]
    h = jnp.maximum(h, 0.0)
    # Linear(128 -> 128 padded) + ReLU; cols 100..127 are exactly zero.
    o = jnp.dot(h, w2_ref[...], preferred_element_type=jnp.float32) + b2_ref[...]
    o_ref[...] = jnp.maximum(o, 0.0).astype(o_ref.dtype)


def prepare_params(w1, b1, w2, b2):
    """One-time layout prep (do NOT call per forward):
    transpose PyTorch (out,in) weights to (in,out) and zero-pad layer 2 to a
    lane-dense 128-wide output."""
    w1_t = jnp.transpose(w1).astype(jnp.float32)                      # (784, 128)
    b1_r = b1.reshape(1, -1).astype(jnp.float32)                      # (1, 128)
    w2_t = jnp.transpose(w2).astype(jnp.float32)                      # (128, 100)
    w2_p = jnp.pad(w2_t, ((0, 0), (0, _N_PAD - _N_OUT)))              # (128, 128)
    b2_p = jnp.pad(b2.reshape(1, -1).astype(jnp.float32),
                   ((0, 0), (0, _N_PAD - _N_OUT)))                    # (1, 128)
    return w1_t, b1_r, w2_p, b2_p


def client_model_forward(x_nchw, params, *, tb=512, lane_dense_output=False):
    """Forward pass of ClientModel.

    x_nchw : (B, 1, 28, 28) float32, NCHW (PyTorch convention)
    params : output of prepare_params(w1, b1, w2, b2)
    returns: (B, 100) float32   (or (B, 128) lane-dense with zero cols 100..127
             when lane_dense_output=True, for a co-designed consumer)
    """
    w1_t, b1_r, w2_p, b2_p = params
    B = x_nchw.shape[0]

    # nn.Flatten(): (B, 1, 28, 28) -> (B, 784), row-major (same as torch).
    x2d = x_nchw.reshape(B, -1).astype(jnp.float32)

    # Batch tile: multiple of 8 sublanes, capped at ceil(B/2) so the parallel
    # grid axis has >= 2 steps whenever B > 8 (v7x: both TCs busy, two DMA
    # streams; harmless elsewhere).  No batch padding: pl.cdiv grid + masked
    # partial last block handle B % tb_eff != 0.
    half = _round_up(pl.cdiv(B, 2), 8)
    tb_eff = max(8, min(tb, half))
    grid = (pl.cdiv(B, tb_eff),)

    flops = 2 * B * (_IN * _H + _H * _N_PAD)
    bytes_accessed = 4 * (B * _IN              # x
                          + _IN * _H + _H      # w1, b1
                          + _H * _N_PAD + _N_PAD  # w2, b2
                          + B * _N_PAD)        # out

    # Raise the scoped-VMEM limit only when the tile actually needs it
    # (v5e default scoped limit is 16 MiB; v6e/v7x default 32 MiB).
    est_vmem = 4 * (2 * tb_eff * (_IN + _N_PAD)                 # x, out double-buffered
                    + 2 * (_IN * _H + _H + _H * _N_PAD + _N_PAD))  # weights/biases
    cp_kwargs = dict(dimension_semantics=("parallel",))
    if est_vmem > (14 << 20):
        cp_kwargs["vmem_limit_bytes"] = min(est_vmem + (8 << 20), 128 << 20)

    out = pl.pallas_call(
        _mlp_kernel,
        out_shape=jax.ShapeDtypeStruct((B, _N_PAD), jnp.float32),
        grid=grid,
        in_specs=[
            pl.BlockSpec((tb_eff, _IN), lambda i: (i, 0)),   # x: marches over batch
            pl.BlockSpec((_IN, _H), lambda i: (0, 0)),       # w1: VMEM-resident
            pl.BlockSpec((1, _H), lambda i: (0, 0)),         # b1
            pl.BlockSpec((_H, _N_PAD), lambda i: (0, 0)),    # w2 (padded)
            pl.BlockSpec((1, _N_PAD), lambda i: (0, 0)),     # b2 (padded)
        ],
        out_specs=pl.BlockSpec((tb_eff, _N_PAD), lambda i: (i, 0)),
        compiler_params=pltpu.CompilerParams(**cp_kwargs),
        cost_estimate=pl.CostEstimate(
            flops=flops, transcendentals=0, bytes_accessed=bytes_accessed),
    )(x2d, w1_t, b1_r, w2_p, b2_p)

    if lane_dense_output:
        return out                 # (B, 128), cols 100..127 exactly zero
    return out[:, :_N_OUT]         # match nn.Module: (B, 100)


def init_params(key):
    """Deterministic N(0,1) init, mirroring nn.init.normal_ on weight & bias
    (PyTorch (out_features, in_features) layout)."""
    k1, k2, k3, k4 = jax.random.split(key, 4)
    w1 = jax.random.normal(k1, (128, 784), dtype=jnp.float32)
    b1 = jax.random.normal(k2, (128,), dtype=jnp.float32)
    w2 = jax.random.normal(k3, (100, 128), dtype=jnp.float32)
    b2 = jax.random.normal(k4, (100,), dtype=jnp.float32)
    return w1, b1, w2, b2


def _reference(x_nchw, w1, b1, w2, b2):
    x2d = x_nchw.reshape(x_nchw.shape[0], -1)
    h = jnp.maximum(x2d @ w1.T + b1, 0.0)
    return jnp.maximum(h @ w2.T + b2, 0.0)


if __name__ == "__main__":
    key = jax.random.PRNGKey(0)
    pkey, xkey, xkey2 = jax.random.split(key, 3)
    w1, b1, w2, b2 = init_params(pkey)
    params = prepare_params(w1, b1, w2, b2)   # hoisted, one-time layout prep

    # Small MNIST-like batch, NCHW (single partial block: 4 rows in an 8-row tile).
    x = jax.random.normal(xkey, (4, 1, 28, 28), dtype=jnp.float32)
    out = jax.block_until_ready(client_model_forward(x, params))
    ref = _reference(x, w1, b1, w2, b2)
    assert out.shape == (4, 100), out.shape
    assert jnp.allclose(out, ref, atol=1e-3, rtol=1e-3), "mismatch vs reference (B=4)"

    # Multi-step grid with a ragged trailing block (20 rows, 8-row tiles -> 3 steps).
    x2 = jax.random.normal(xkey2, (20, 1, 28, 28), dtype=jnp.float32)
    out2 = jax.block_until_ready(client_model_forward(x2, params, tb=8))
    ref2 = _reference(x2, w1, b1, w2, b2)
    assert out2.shape == (20, 100), out2.shape
    assert jnp.allclose(out2, ref2, atol=1e-3, rtol=1e-3), "mismatch vs reference (B=20)"

    # Lane-dense path: (B, 128) with exactly-zero padded columns.
    out3 = jax.block_until_ready(
        client_model_forward(x2, params, tb=8, lane_dense_output=True))
    assert out3.shape == (20, 128), out3.shape
    assert jnp.allclose(out3[:, :100], ref2, atol=1e-3, rtol=1e-3)
    assert jnp.all(out3[:, 100:] == 0.0), "padded output columns must be zero"

    print("KERNEL_OK")
</pallas_src>

<mosaic_0001>
module attributes {stable_mosaic.version = 11 : i64} {
  func.func @_mlp_kernel(%arg0: i32, %arg1: memref<8x784xf32, #tpu.memory_space<vmem>>, %arg2: memref<784x128xf32, #tpu.memory_space<vmem>>, %arg3: memref<1x128xf32, #tpu.memory_space<vmem>>, %arg4: memref<128x128xf32, #tpu.memory_space<vmem>>, %arg5: memref<1x128xf32, #tpu.memory_space<vmem>>, %arg6: memref<8x128xf32, #tpu.memory_space<vmem>>) attributes {dimension_semantics = [#tpu.dimension_semantics<parallel>], iteration_bounds = array<i64: 1>, scalar_prefetch = 0 : i64, scratch_operands = 0 : i64, tpu.core_type = #tpu.core_type<tc>, window_params = [{transform_indices = @transform_0, window_bounds = array<i64: 8, 784>}, {pipeline_mode = #tpu.pipeline_mode<synchronous>, transform_indices = @transform_1, window_bounds = array<i64: 784, 128>}, {pipeline_mode = #tpu.pipeline_mode<synchronous>, transform_indices = @transform_2, window_bounds = array<i64: 1, 128>}, {pipeline_mode = #tpu.pipeline_mode<synchronous>, transform_indices = @transform_3, window_bounds = array<i64: 128, 128>}, {pipeline_mode = #tpu.pipeline_mode<synchronous>, transform_indices = @transform_4, window_bounds = array<i64: 1, 128>}, {transform_indices = @transform_5, window_bounds = array<i64: 8, 128>}]} {
    %c0 = arith.constant 0 : index
    %c0_0 = arith.constant 0 : index
    %0 = vector.load %arg1[%c0, %c0_0] : memref<8x784xf32, #tpu.memory_space<vmem>>, vector<8x784xf32>
    %c0_1 = arith.constant 0 : index
    %c0_2 = arith.constant 0 : index
    %1 = vector.load %arg2[%c0_1, %c0_2] : memref<784x128xf32, #tpu.memory_space<vmem>>, vector<784x128xf32>
    %cst = arith.constant dense<0.000000e+00> : vector<8x128xf32>
    %2 = tpu.matmul %0, %1, %cst {dimension_numbers = #tpu.dot_dimension_numbers<[1], [0], [0], [1], [0, 0, 1, 1], [], []>} : vector<8x784xf32>, vector<784x128xf32>, vector<8x128xf32> -> vector<8x128xf32>
    %c0_3 = arith.constant 0 : index
    %c0_4 = arith.constant 0 : index
    %3 = vector.load %arg3[%c0_3, %c0_4] : memref<1x128xf32, #tpu.memory_space<vmem>>, vector<1x128xf32>
    %4 = vector.broadcast %3 : vector<1x128xf32> to vector<8x128xf32>
    %5 = arith.addf %2, %4 : vector<8x128xf32>
    %cst_5 = arith.constant 0.000000e+00 : f32
    %6 = vector.broadcast %cst_5 : f32 to vector<8x128xf32>
    %7 = arith.maximumf %5, %6 : vector<8x128xf32>
    %c0_6 = arith.constant 0 : index
    %c0_7 = arith.constant 0 : index
    %8 = vector.load %arg4[%c0_6, %c0_7] : memref<128x128xf32, #tpu.memory_space<vmem>>, vector<128x128xf32>
    %cst_8 = arith.constant dense<0.000000e+00> : vector<8x128xf32>
    %9 = tpu.matmul %7, %8, %cst_8 {dimension_numbers = #tpu.dot_dimension_numbers<[1], [0], [0], [1], [0, 0, 1, 1], [], []>} : vector<8x128xf32>, vector<128x128xf32>, vector<8x128xf32> -> vector<8x128xf32>
    %c0_9 = arith.constant 0 : index
    %c0_10 = arith.constant 0 : index
    %10 = vector.load %arg5[%c0_9, %c0_10] : memref<1x128xf32, #tpu.memory_space<vmem>>, vector<1x128xf32>
    %11 = vector.broadcast %10 : vector<1x128xf32> to vector<8x128xf32>
    %12 = arith.addf %9, %11 : vector<8x128xf32>
    %cst_11 = arith.constant 0.000000e+00 : f32
    %13 = vector.broadcast %cst_11 : f32 to vector<8x128xf32>
    %14 = arith.maximumf %12, %13 : vector<8x128xf32>
    %c0_12 = arith.constant 0 : index
    %c0_13 = arith.constant 0 : index
    %15 = vector.load %arg6[%c0_12, %c0_13] : memref<8x128xf32, #tpu.memory_space<vmem>>, vector<8x128xf32>
    tpu.vector_store %arg6[%c0_12, %c0_13], %14 {strides = array<i32>} : memref<8x128xf32, #tpu.memory_space<vmem>>, vector<8x128xf32>,
    return
  }
  func.func @transform_0(%arg0: i32) -> (i32, i32) {
    %c0_i32 = arith.constant 0 : i32
    %c0_i32_0 = arith.constant 0 : i32
    return %arg0, %c0_i32 : i32, i32
  }
  func.func @transform_1(%arg0: i32) -> (i32, i32) {
    %c0_i32 = arith.constant 0 : i32
    %c0_i32_0 = arith.constant 0 : i32
    %c0_i32_1 = arith.constant 0 : i32
    return %c0_i32, %c0_i32_0 : i32, i32
  }
  func.func @transform_2(%arg0: i32) -> (i32, i32) {
    %c0_i32 = arith.constant 0 : i32
    %c0_i32_0 = arith.constant 0 : i32
    %c0_i32_1 = arith.constant 0 : i32
    return %c0_i32, %c0_i32_0 : i32, i32
  }
  func.func @transform_3(%arg0: i32) -> (i32, i32) {
    %c0_i32 = arith.constant 0 : i32
    %c0_i32_0 = arith.constant 0 : i32
    %c0_i32_1 = arith.constant 0 : i32
    return %c0_i32, %c0_i32_0 : i32, i32
  }
  func.func @transform_4(%arg0: i32) -> (i32, i32) {
    %c0_i32 = arith.constant 0 : i32
    %c0_i32_0 = arith.constant 0 : i32
    %c0_i32_1 = arith.constant 0 : i32
    return %c0_i32, %c0_i32_0 : i32, i32
  }
  func.func @transform_5(%arg0: i32) -> (i32, i32) {
    %c0_i32 = arith.constant 0 : i32
    %c0_i32_0 = arith.constant 0 : i32
    return %arg0, %c0_i32 : i32, i32
  }
}

</mosaic_0001>

<bundles_post_ra>
// kernel: tpu_custom_call.1
= control target key start
LH: loop header
LB: loop body
LE: loop exit
PB: predicated region body
PF: predicated region fallthrough
CT: control target
= control target key end

     0   :  { %10 = vsyncpa [#allocation3], 0  ;;  %s1117_s0 = inlined_call_operand.hbm [shape: f32[4,784], index: 0, kind: input, shape index: {}]   ;;  %s1118_s1 = inlined_call_operand.hbm [shape: f32[784,128], index: 1, kind: input, shape index: {}]   ;;  %s1119_s2 = inlined_call_operand.vmem [shape: f32[1,128], index: 2, kind: input, shape index: {}]   ;;  %s1120_s3 = inlined_call_operand.hbm [shape: f32[128,128], index: 3, kind: input, shape index: {}]   ;;  %s1121_s4 = inlined_call_operand.vmem [shape: f32[1,128], index: 4, kind: input, shape index: {}]   ;;  %s1122_s5 = inlined_call_operand.hbm [shape: f32[4,128], index: 5, kind: output, shape index: {}]  }
   0x1   :  { %11 = vsyncpa [#allocation6], 0 }
   0x2   :  { %12 = vsyncpa [#allocation4], 0 }
   0x3   :  { %17 = vsyncadd [#allocation3], 448  ;;  %s1003_s18 = smov [#allocation5]   ;;  %s909_s22 = scalar_lea.hbm %s1118_s1, 12544 }
   0x4   :  { %s30_s19 = sshll.u32 %s1003_s18, 4  ;;  %p910_p0 = scmp.ne.s32.totalorder %s1118_s1, %s909_s22  ;;  %s31_s19 = int_to_ptr.vmem [resolvable:$true] %s30_s19 }
   0x5   :  { %p913_p1 = scmp.lt.u32.totalorder %s909_s22, %s1118_s1 }
   0x7   :  { %p915_p2 = pnand %p913_p1, %p910_p0 }
   0x9   :  { %918 = shalt.err (!%p915_p2)
}
   0xa   :  { %s919_s27 = scalar_lea.vmem %s31_s19, 12544  ;;  %p924_p4 = scmp.lt.s32.totalorder %s31_s19, %s31_s19 }
   0xb   :  { %p920_p3 = scmp.ne.s32.totalorder %s31_s19, %s919_s27  ;;  %p925_p5 = scmp.lt.s32.totalorder %s919_s27, %s919_s27 }
   0xd   :  { %p926_p6 = por %p925_p5, %p924_p4 }
   0xf   :  { %p927_p7 = pnand %p926_p6, %p920_p3 }
  0x11   :  { %930 = shalt.err (!%p927_p7)
}
  0x12   :  { %s1004_s28 = smov 128   ;;  %s1005_s29 = smov 8  }
  0x13   :  { %36 = dma.hbm_to_vmem [thread:$0]  %s1118_s1, 12544, %s31_s19, [#allocation6], %s1004_s28, %s1004_s28, %s1005_s29  }
  0x14   :  { %s1006_s7 = smov [#allocation2]   ;;  %s931_s11 = scalar_lea.hbm %s1117_s0, 448 }
  0x15   :  { %s18_s8 = sshll.u32 %s1006_s7, 4  ;;  %p932_p8 = scmp.ne.s32.totalorder %s1117_s0, %s931_s11  ;;  %s19_s8 = int_to_ptr.vmem [resolvable:$true] %s18_s8 }
  0x16   :  { %p935_p9 = scmp.lt.u32.totalorder %s931_s11, %s1117_s0 }
  0x18   :  { %p937_p10 = pnand %p935_p9, %p932_p8 }
  0x1a   :  { %940 = shalt.err (!%p937_p10)
}
  0x1b   :  { %s941_s16 = scalar_lea.vmem %s19_s8, 448  ;;  %s945_s1 = scalar_lea.vmem %s19_s8, 896 }
  0x1c   :  { %p942_p11 = scmp.ne.s32.totalorder %s19_s8, %s941_s16  ;;  %p946_p12 = scmp.lt.s32.totalorder %s19_s8, %s19_s8 }
  0x1d   :  { %p947_p13 = scmp.lt.s32.totalorder %s945_s1, %s941_s16 }
  0x1f   :  { %p948_p0 = por %p947_p13, %p946_p12 }
  0x21   :  { %p949_p1 = pnand %p948_p0, %p942_p11 }
  0x23   :  { %952 = shalt.err (!%p949_p1)
}
  0x24   :  { %s1007_s17 = smov 448   ;;  %s1008_s18 = smov 28  }
  0x25   :  { %24 = dma.hbm_to_vmem [thread:$0]  %s1117_s0, 448, %s19_s8, [#allocation3], %s1007_s17, %s1007_s17, %s1008_s18  }
  0x26   :  { %s1009_s21 = smov [#allocation7]   ;;  %s953_s25 = scalar_lea.hbm %s1120_s3, 2048 }
  0x27   :  { %s44_s22 = sshll.u32 %s1009_s21, 4  ;;  %p954_p2 = scmp.ne.s32.totalorder %s1120_s3, %s953_s25  ;;  %s45_s22 = int_to_ptr.vmem [resolvable:$true] %s44_s22 }
  0x28   :  { %p957_p3 = scmp.lt.u32.totalorder %s953_s25, %s1120_s3 }
  0x2a   :  { %p959_p4 = pnand %p957_p3, %p954_p2 }
  0x2c   :  { %962 = shalt.err (!%p959_p4)
}
  0x2d   :  { %s963_s7 = scalar_lea.vmem %s45_s22, 2048  ;;  %p968_p6 = scmp.lt.s32.totalorder %s45_s22, %s45_s22 }
  0x2e   :  { %p964_p5 = scmp.ne.s32.totalorder %s45_s22, %s963_s7  ;;  %p969_p7 = scmp.lt.s32.totalorder %s963_s7, %s963_s7 }
  0x30   :  { %p970_p8 = por %p969_p7, %p968_p6 }
  0x32   :  { %p971_p9 = pnand %p970_p8, %p964_p5 }
  0x34   :  { %974 = shalt.err (!%p971_p9)
}
  0x35   :  { %50 = dma.hbm_to_vmem [thread:$0]  %s1120_s3, 2048, %s45_s22, [#allocation6], %s1004_s28, %s1004_s28, %s1005_s29  }
  0x36   :  { %997 = dma.done.wait [#allocation3], 896  }
  0x37   :  { %998 = vsyncadd [#allocation3], 4294966400 }
  0x38   :  { %999 = dma.done.wait [#allocation6], 14592  }
  0x39   :  { %1000 = vsyncadd [#allocation6], 4294952704  ;;  %v86_v0 = vld [vmem:[#allocation5 + $0x80] sm:$0xff]  ;;  %v87_v1 = vld [vmem:[#allocation5 + $0x88] sm:$0xff]  ;;  %vm1011_vm0 = vmmov 0   ;;  %vm196_vm1 = vcmask 130048  }
  0x3a   :  { %v70_v2 = vld [vmem:[#allocation5] sm:$0xff]  ;;  %v763_v3 = vpack.c.bf16 %v87_v1, %v86_v0  ;;  %v71_v4 = vld [vmem:[#allocation5 + $0x8] sm:$0xff]  ;;  %v88_v11 = vld [vmem:[#allocation5 + $0x90] sm:$0xff] }
  0x3b   :  { %v118_v5 = vld [vmem:[#allocation5 + $0x180] sm:$0xff]  ;;  %v119_v6 = vld [vmem:[#allocation5 + $0x188] sm:$0xff]  ;;  %v765_v7 = vpack.c.bf16 %v71_v4, %v70_v2  ;;  %v89_v13 = vld [vmem:[#allocation5 + $0x98] sm:$0xff] }
  0x3c   :  { %v795_v8 = vpack.c.bf16 %v119_v6, %v118_v5  ;;  %v102_v9 = vld [vmem:[#allocation5 + $0x100] sm:$0xff]  ;;  %v103_v10 = vld [vmem:[#allocation5 + $0x108] sm:$0xff]  ;;  %764 = vmatprep.subr.bf16.mxu0 %v763_v3  ;;  %v72_v14 = vld [vmem:[#allocation5 + $0x10] sm:$0xff]  ;;  %v767_v16 = vpack.c.bf16 %v89_v13, %v88_v11 }
  0x3d   :  { %v797_v12 = vpack.c.bf16 %v103_v10, %v102_v9  ;;  %v73_v15 = vld [vmem:[#allocation5 + $0x18] sm:$0xff]  ;;  %766 = vmatpush3.bf16.msra.mxu0 %v765_v7  ;;  %v120_v18 = vld [vmem:[#allocation5 + $0x190] sm:$0xff]  ;;  %v90_v23 = vld [vmem:[#allocation5 + $0xa0] sm:$0xff] }
  0x3e   :  { %796 = vmatprep.subr.bf16.mxu1 %v795_v8  ;;  %v769_v17 = vpack.c.bf16 %v73_v15, %v72_v14  ;;  %v121_v19 = vld [vmem:[#allocation5 + $0x198] sm:$0xff]  ;;  %v104_v20 = vld [vmem:[#allocation5 + $0x110] sm:$0xff]  ;;  %v91_v24 = vld [vmem:[#allocation5 + $0xa8] sm:$0xff]  ;;  %768 = vmatprep.subr.bf16.mxu0 %v767_v16 }
  0x3f   :  { %798 = vmatpush3.bf16.msra.mxu1 %v797_v12  ;;  %v799_v21 = vpack.c.bf16 %v121_v19, %v120_v18  ;;  %v105_v22 = vld [vmem:[#allocation5 + $0x118] sm:$0xff]  ;;  %v771_v26 = vpack.c.bf16 %v91_v24, %v90_v23  ;;  %v74_v27 = vld [vmem:[#allocation5 + $0x20] sm:$0xff]  ;;  %v75_v28 = vld [vmem:[#allocation5 + $0x28] sm:$0xff] }
  0x40   :  { %v801_v25 = vpack.c.bf16 %v105_v22, %v104_v20  ;;  %v122_v29 = vld [vmem:[#allocation5 + $0x1a0] sm:$0xff]  ;;  %v123_v30 = vld [vmem:[#allocation5 + $0x1a8] sm:$0xff]  ;;  %v773_v33 = vpack.c.bf16 %v75_v28, %v74_v27  ;;  %v92_v35 = vld [vmem:[#allocation5 + $0xb0] sm:$0xff] }
  0x41   :  { %800 = vmatprep.subr.bf16.mxu1 %v799_v21  ;;  %v106_v31 = vld [vmem:[#allocation5 + $0x120] sm:$0xff]  ;;  %v107_v32 = vld [vmem:[#allocation5 + $0x128] sm:$0xff]  ;;  %770 = vmatpush3.bf16.msra.mxu0 %v769_v17  ;;  %v803_v34 = vpack.c.bf16 %v123_v30, %v122_v29  ;;  %v93_v36 = vld [vmem:[#allocation5 + $0xb8] sm:$0xff] }
  0x42   :  { %v76_v37 = vld [vmem:[#allocation5 + $0x30] sm:$0xff]  ;;  %772 = vmatprep.subr.bf16.mxu0 %v771_v26  ;;  %v805_v38 = vpack.c.bf16 %v107_v32, %v106_v31  ;;  %v775_v39 = vpack.c.bf16 %v93_v36, %v92_v35  ;;  %v77_v40 = vld [vmem:[#allocation5 + $0x38] sm:$0xff]  ;;  %v94_v46 = vld [vmem:[#allocation5 + $0xc0] sm:$0xff] }
  0x43   :  { %802 = vmatpush3.bf16.msra.mxu1 %v801_v25  ;;  %v124_v41 = vld [vmem:[#allocation5 + $0x1b0] sm:$0xff]  ;;  %v125_v42 = vld [vmem:[#allocation5 + $0x1b8] sm:$0xff]  ;;  %v95_v47 = vld [vmem:[#allocation5 + $0xc8] sm:$0xff]  ;;  %v777_v48 = vpack.c.bf16 %v77_v40, %v76_v37 }
  0x44   :  { %804 = vmatprep.subr.bf16.mxu1 %v803_v34  ;;  %v807_v43 = vpack.c.bf16 %v125_v42, %v124_v41  ;;  %v108_v44 = vld [vmem:[#allocation5 + $0x130] sm:$0xff]  ;;  %v109_v45 = vld [vmem:[#allocation5 + $0x138] sm:$0xff]  ;;  %v126_v49 = vld [vmem:[#allocation5 + $0x1c0] sm:$0xff]  ;;  %v779_v52 = vpack.c.bf16 %v95_v47, %v94_v46 }
  0x45   :  { %774 = vmatpush3.bf16.msra.mxu0 %v773_v33  ;;  %v127_v50 = vld [vmem:[#allocation5 + $0x1c8] sm:$0xff]  ;;  %v809_v51 = vpack.c.bf16 %v109_v45, %v108_v44  ;;  %v78_v53 = vld [vmem:[#allocation5 + $0x40] sm:$0xff]  ;;  %v96_v58 = vld [vmem:[#allocation5 + $0xd0] sm:$0xff] }
  0x46   :  { %776 = vmatprep.subr.bf16.mxu0 %v775_v39  ;;  %v79_v54 = vld [vmem:[#allocation5 + $0x48] sm:$0xff]  ;;  %v110_v55 = vld [vmem:[#allocation5 + $0x140] sm:$0xff]  ;;  %v811_v56 = vpack.c.bf16 %v127_v50, %v126_v49  ;;  %v97_v59 = vld [vmem:[#allocation5 + $0xd8] sm:$0xff]  ;;  %v1010_v49 = vmov 0.0|0.0  }
  0x47   :  { %806 = vmatpush3.bf16.msra.mxu1 %v805_v38  ;;  %v111_v57 = vld [vmem:[#allocation5 + $0x148] sm:$0xff]  ;;  %v128_v60 = vld [vmem:[#allocation5 + $0x1d0] sm:$0xff]  ;;  %v129_v61 = vld [vmem:[#allocation5 + $0x1d8] sm:$0xff]  ;;  %v781_v62 = vpack.c.bf16 %v79_v54, %v78_v53  ;;  %v783_v0 = vpack.c.bf16 %v97_v59, %v96_v58 }
  0x48   :  { %808 = vmatprep.subr.bf16.mxu1 %v807_v43  ;;  %v813_v63 = vpack.c.bf16 %v111_v57, %v110_v55  ;;  %v80_v1 = vld [vmem:[#allocation5 + $0x50] sm:$0xff]  ;;  %v81_v2 = vld [vmem:[#allocation5 + $0x58] sm:$0xff]  ;;  %v815_v4 = vpack.c.bf16 %v129_v61, %v128_v60  ;;  %v98_v6 = vld [vmem:[#allocation5 + $0xe0] sm:$0xff]  ;;  %v1012_v60 = vmov 0.0  }
  0x49   :  { %778 = vmatpush3.bf16.msra.mxu0 %v777_v48  ;;  %v112_v3 = vld [vmem:[#allocation5 + $0x150] sm:$0xff]  ;;  %v113_v5 = vld [vmem:[#allocation5 + $0x158] sm:$0xff]  ;;  %v99_v7 = vld [vmem:[#allocation5 + $0xe8] sm:$0xff]  ;;  %v785_v11 = vpack.c.bf16 %v81_v2, %v80_v1 }
  0x4a   :  { %780 = vmatprep.subr.bf16.mxu0 %v779_v52  ;;  %v82_v8 = vld [vmem:[#allocation5 + $0x60] sm:$0xff]  ;;  %v131_v10 = vld [vmem:[#allocation5 + $0x1e8] sm:$0xff]  ;;  %v817_v14 = vpack.c.bf16 %v113_v5, %v112_v3  ;;  %v787_v15 = vpack.c.bf16 %v99_v7, %v98_v6  ;;  %v100_v19 = vld [vmem:[#allocation5 + $0xf0] sm:$0xff] }
  0x4b   :  { %810 = vmatpush3.bf16.msra.mxu1 %v809_v51  ;;  %v130_v9 = vld [vmem:[#allocation5 + $0x1e0] sm:$0xff]  ;;  %v83_v12 = vld [vmem:[#allocation5 + $0x68] sm:$0xff]  ;;  %v101_v20 = vld [vmem:[#allocation5 + $0xf8] sm:$0xff] }
  0x4c   :  { %812 = vmatprep.subr.bf16.mxu1 %v811_v56  ;;  %v114_v13 = vld [vmem:[#allocation5 + $0x160] sm:$0xff]  ;;  %v115_v16 = vld [vmem:[#allocation5 + $0x168] sm:$0xff]  ;;  %v819_v18 = vpack.c.bf16 %v131_v10, %v130_v9  ;;  %v132_v21 = vld [vmem:[#allocation5 + $0x1f0] sm:$0xff]  ;;  %v789_v23 = vpack.c.bf16 %v83_v12, %v82_v8  ;;  %v791_v26 = vpack.c.bf16 %v101_v20, %v100_v19 }
  0x4d   :  { %782 = vmatpush3.bf16.msra.mxu0 %v781_v62  ;;  %v901_v17 = vld [vmem:[#allocation2 + $0x4] ss:$28 sps:$4 sm:$0xff]   ;;  %v133_v22 = vld [vmem:[#allocation5 + $0x1f8] sm:$0xff]  ;;  %v904_v24 = vld [vmem:[#allocation2 + $0xc] ss:$28 sps:$4 sm:$0xff]   ;;  %v821_v25 = vpack.c.bf16 %v115_v16, %v114_v13 }
  0x4e   :  { %784 = vmatprep.subr.bf16.mxu0 %v783_v0  ;;  %263 = vmatprep.mubr.f32.mxu0 %v901_v17  ;;  %v84_v27 = vld [vmem:[#allocation5 + $0x70] sm:$0xff]  ;;  %v85_v28 = vld [vmem:[#allocation5 + $0x78] sm:$0xff]  ;;  %v823_v30 = vpack.c.bf16 %v133_v22, %v132_v21  ;;  %v150_v32 = vld [vmem:[#allocation5 + $0x280] sm:$0xff] }
  0x4f   :  { %814 = vmatpush3.bf16.msra.mxu1 %v813_v63  ;;  %v116_v29 = vld [vmem:[#allocation5 + $0x170] sm:$0xff]  ;;  %v117_v31 = vld [vmem:[#allocation5 + $0x178] sm:$0xff]  ;;  %v151_v33 = vld [vmem:[#allocation5 + $0x288] sm:$0xff]  ;;  %333 = vmatprep.mubr.f32.mxu1 %v904_v24  ;;  %v793_v34 = vpack.c.bf16 %v85_v28, %v84_v27 }
  0x50   :  { %816 = vmatprep.subr.bf16.mxu1 %v815_v4  ;;  %v825_v35 = vpack.c.bf16 %v117_v31, %v116_v29  ;;  %v827_v36 = vpack.c.bf16 %v151_v33, %v150_v32  ;;  %v134_v37 = vld [vmem:[#allocation5 + $0x200] sm:$0xff]  ;;  %v135_v38 = vld [vmem:[#allocation5 + $0x208] sm:$0xff]  ;;  %v152_v39 = vld [vmem:[#allocation5 + $0x290] sm:$0xff] }
  0x51   :  { %786 = vmatpush3.bf16.msra.mxu0 %v785_v11  ;;  %v153_v40 = vld [vmem:[#allocation5 + $0x298] sm:$0xff]  ;;  %v899_v41 = vld [vmem:[#allocation2] ss:$28 sps:$4 sm:$0xff]   ;;  %v902_v42 = vld [vmem:[#allocation2 + $0x8] ss:$28 sps:$4 sm:$0xff]   ;;  %v829_v43 = vpack.c.bf16 %v135_v38, %v134_v37 }
  0x52   :  { %788 = vmatprep.subr.bf16.mxu0 %v787_v15  ;;  %v831_v44 = vpack.c.bf16 %v153_v40, %v152_v39  ;;  %v136_v45 = vld [vmem:[#allocation5 + $0x210] sm:$0xff]  ;;  %v137_v46 = vld [vmem:[#allocation5 + $0x218] sm:$0xff]  ;;  %v154_v47 = vld [vmem:[#allocation5 + $0x2a0] sm:$0xff] }
  0x53   :  { %818 = vmatpush3.bf16.msra.mxu1 %v817_v14  ;;  %v155_v48 = vld [vmem:[#allocation5 + $0x2a8] sm:$0xff]  ;;  %v907_v50 = vld [vmem:[#allocation2 + $0x14] ss:$28 sps:$4 sm:$0xff]   ;;  %v833_v51 = vpack.c.bf16 %v137_v46, %v136_v45  ;;  %v166_v52 = vld [vmem:[#allocation5 + $0x300] sm:$0xff] }
  0x54   :  { %820 = vmatprep.subr.bf16.mxu1 %v819_v18  ;;  %v167_v53 = vld [vmem:[#allocation5 + $0x308] sm:$0xff]  ;;  %v835_v54 = vpack.c.bf16 %v155_v48, %v154_v47  ;;  %v138_v55 = vld [vmem:[#allocation5 + $0x220] sm:$0xff]  ;;  %v156_v58 = vld [vmem:[#allocation5 + $0x2b0] sm:$0xff] }
  0x55   :  { %790 = vmatpush3.bf16.msra.mxu0 %v789_v23  ;;  %v139_v56 = vld [vmem:[#allocation5 + $0x228] sm:$0xff]  ;;  %v860_v57 = vpack.c.bf16 %v167_v53, %v166_v52  ;;  %v157_v59 = vld [vmem:[#allocation5 + $0x2b8] sm:$0xff]  ;;  %v140_v0 = vld [vmem:[#allocation5 + $0x230] sm:$0xff] }
  0x56   :  { %792 = vmatprep.subr.bf16.mxu0 %v791_v26  ;;  %v908_v61 = vld [vmem:[#allocation2 + $0x18] ss:$28 sps:$4 sm:$0xff]   ;;  %v837_v62 = vpack.c.bf16 %v139_v56, %v138_v55  ;;  %v839_v63 = vpack.c.bf16 %v157_v59, %v156_v58  ;;  %v159_v3 = vld [vmem:[#allocation5 + $0x2c8] sm:$0xff]  ;;  %v160_v8 = vld [vmem:[#allocation5 + $0x2d0] sm:$0xff] }
  0x57   :  { %822 = vmatpush3.bf16.msra.mxu1 %v821_v25  ;;  %v141_v1 = vld [vmem:[#allocation5 + $0x238] sm:$0xff]  ;;  %v158_v2 = vld [vmem:[#allocation5 + $0x2c0] sm:$0xff]  ;;  %v143_v7 = vld [vmem:[#allocation5 + $0x248] sm:$0xff] }
  0x58   :  { %824 = vmatprep.subr.bf16.mxu1 %v823_v30  ;;  %v841_v4 = vpack.c.bf16 %v141_v1, %v140_v0  ;;  %v843_v5 = vpack.c.bf16 %v159_v3, %v158_v2  ;;  %v142_v6 = vld [vmem:[#allocation5 + $0x240] sm:$0xff]  ;;  %v161_v9 = vld [vmem:[#allocation5 + $0x2d8] sm:$0xff]  ;;  %v144_v12 = vld [vmem:[#allocation5 + $0x250] sm:$0xff] }
  0x59   :  { %794 = vmatpush3.bf16.msra.mxu0 %v793_v34  ;;  %v845_v10 = vpack.c.bf16 %v143_v7, %v142_v6  ;;  %v847_v11 = vpack.c.bf16 %v161_v9, %v160_v8  ;;  %v145_v13 = vld [vmem:[#allocation5 + $0x258] sm:$0xff]  ;;  %v162_v14 = vld [vmem:[#allocation5 + $0x2e0] sm:$0xff]  ;;  %v163_v15 = vld [vmem:[#allocation5 + $0x2e8] sm:$0xff] }
  0x5a   :  { %828 = vmatprep.subr.bf16.mxu0 %v827_v36  ;;  %v849_v16 = vpack.c.bf16 %v145_v13, %v144_v12  ;;  %v851_v17 = vpack.c.bf16 %v163_v15, %v162_v14  ;;  %v146_v18 = vld [vmem:[#allocation5 + $0x260] sm:$0xff]  ;;  %v147_v19 = vld [vmem:[#allocation5 + $0x268] sm:$0xff]  ;;  %v164_v20 = vld [vmem:[#allocation5 + $0x2f0] sm:$0xff] }
  0x5b   :  { %826 = vmatpush3.bf16.msra.mxu1 %v825_v35  ;;  %v165_v21 = vld [vmem:[#allocation5 + $0x2f8] sm:$0xff]  ;;  %v853_v22 = vpack.c.bf16 %v147_v19, %v146_v18  ;;  %v148_v24 = vld [vmem:[#allocation5 + $0x270] sm:$0xff]  ;;  %v482_v30 = vld [vmem:[#allocation7 + $0x10] sm:$0xff] }
  0x5c   :  { %859 = vmatprep.subr.bf16.mxu1 %v1010_v49  ;;  %264 = vmatmul.mubr.f32.vlgmr.msra.gmra.mrb[0].mxu0 %v899_v41  ;;  %v855_v23 = vpack.c.bf16 %v165_v21, %v164_v20  ;;  %v149_v25 = vld [vmem:[#allocation5 + $0x278] sm:$0xff]  ;;  %v480_v28 = vld [vmem:[#allocation7] sm:$0xff]  ;;  %v483_v32 = vld [vmem:[#allocation7 + $0x18] sm:$0xff] }
  0x5d   :  { %830 = vmatpush3.bf16.msra.mxu0 %v829_v43  ;;  %403 = vmatprep.mubr.f32.mxu0 %v907_v50  ;;  %v857_v26 = vpack.c.bf16 %v149_v25, %v148_v24  ;;  %v905_v27 = vld [vmem:[#allocation2 + $0x10] ss:$28 sps:$4 sm:$0xff]   ;;  %v866_v33 = vpack.c.bf16 %v483_v32, %v482_v30  ;;  %v486_v37 = vld [vmem:[#allocation7 + $0x30] sm:$0xff]  ;;  %v487_v38 = vld [vmem:[#allocation7 + $0x38] sm:$0xff] }
  0x5e   :  { %334 = vmatmul.mubr.f32.vlgmr.msra.gmra.mrb[0].mxu1 %v902_v42  ;;  %832 = vmatprep.subr.bf16.mxu0 %v831_v44  ;;  %v481_v29 = vld [vmem:[#allocation7 + $0x8] sm:$0xff]  ;;  %v484_v34 = vld [vmem:[#allocation7 + $0x20] sm:$0xff]  ;;  %v872_v39 = vpack.c.bf16 %v487_v38, %v486_v37  ;;  %v490_v43 = vld [vmem:[#allocation7 + $0x50] sm:$0xff] }
  0x5f   :  { %725 = vmatprep.mubr.msk.f32.mxu1 %vm1011_vm0, %v1012_v60  ;;  %861 = vmatpush3.bf16.msra.mxu1 %v860_v57  ;;  %v863_v31 = vpack.c.bf16 %v481_v29, %v480_v28  ;;  %v485_v35 = vld [vmem:[#allocation7 + $0x28] sm:$0xff]  ;;  %v488_v40 = vld [vmem:[#allocation7 + $0x40] sm:$0xff]  ;;  %v491_v44 = vld [vmem:[#allocation7 + $0x58] sm:$0xff] }
  0x60   :  { %862 = vmatprep.subr.bf16.mxu1 %v1010_v49  ;;  %v869_v36 = vpack.c.bf16 %v485_v35, %v484_v34  ;;  %v489_v41 = vld [vmem:[#allocation7 + $0x48] sm:$0xff]  ;;  %v878_v45 = vpack.c.bf16 %v491_v44, %v490_v43  ;;  %v492_v46 = vld [vmem:[#allocation7 + $0x60] sm:$0xff]  ;;  %v494_v50 = vld [vmem:[#allocation7 + $0x70] sm:$0xff] }
  0x61   :  { %834 = vmatpush3.bf16.msra.mxu0 %v833_v51  ;;  %v875_v42 = vpack.c.bf16 %v489_v41, %v488_v40  ;;  %v493_v47 = vld [vmem:[#allocation7 + $0x68] sm:$0xff]  ;;  %v495_v51 = vld [vmem:[#allocation7 + $0x78] sm:$0xff] }
  0x62   :  { %836 = vmatprep.subr.bf16.mxu0 %v835_v54  ;;  %726 = vmatmul.mubr.msk.f32.vlgmr.msra.gmra.mrb[2].mxu1 %vm196_vm1, %v908_v61  ;;  %v881_v48 = vpack.c.bf16 %v493_v47, %v492_v46  ;;  %v884_v52 = vpack.c.bf16 %v495_v51, %v494_v50  ;;  %v593_v54 = vld [vmem:[%s1119_s2] ss:$0 sm:$0xff] }
  0x63   :  { %760 = vmatprep.mubr.msk.f32.mxu1 %vm1011_vm0, %v1012_v60  ;;  %864 = vmatpush3.bf16.msra.mxu1 %v863_v31 }
  0x64   :  { %865 = vmatprep.subr.bf16.mxu1 %v1010_v49 }
  0x65   :  { %838 = vmatpush3.bf16.msra.mxu0 %v837_v62 }
  0x66   :  { %840 = vmatprep.subr.bf16.mxu0 %v839_v63 }
  0x67   :  { %867 = vmatpush3.bf16.msra.mxu1 %v866_v33 }
  0x68   :  { %868 = vmatprep.subr.bf16.mxu1 %v1010_v49 }
  0x69   :  { %842 = vmatpush3.bf16.msra.mxu0 %v841_v4 }
  0x6a   :  { %844 = vmatprep.subr.bf16.mxu0 %v843_v5  ;;  %v595_v5 = vld [vmem:[%s1121_s4] ss:$0 sm:$0xff] }
  0x6b   :  { %870 = vmatpush3.bf16.msra.mxu1 %v869_v36 }
  0x6c   :  { %871 = vmatprep.subr.bf16.mxu1 %v1010_v49 }
  0x6d   :  { %846 = vmatpush3.bf16.msra.mxu0 %v845_v10 }
  0x6e   :  { %848 = vmatprep.subr.bf16.mxu0 %v847_v11 }
  0x6f   :  { %873 = vmatpush3.bf16.msra.mxu1 %v872_v39 }
  0x70   :  { %874 = vmatprep.subr.bf16.mxu1 %v1010_v49 }
  0x71   :  { %850 = vmatpush3.bf16.msra.mxu0 %v849_v16 }
  0x72   :  { %852 = vmatprep.subr.bf16.mxu0 %v851_v17 }
  0x73   :  { %876 = vmatpush3.bf16.msra.mxu1 %v875_v42 }
  0x74   :  { %877 = vmatprep.subr.bf16.mxu1 %v1010_v49 }
  0x75   :  { %854 = vmatpush3.bf16.msra.mxu0 %v853_v22 }
  0x76   :  { %856 = vmatprep.subr.bf16.mxu0 %v855_v23 }
  0x77   :  { %879 = vmatpush3.bf16.msra.mxu1 %v878_v45 }
  0x78   :  { %880 = vmatprep.subr.bf16.mxu1 %v1010_v49 }
  0x79   :  { %858 = vmatpush3.bf16.msra.mxu0 %v857_v26 }
  0x7b   :  { %882 = vmatpush3.bf16.msra.mxu1 %v881_v48 }
  0x7c   :  { %404 = vmatmul.mubr.f32.vlgmr.msra.gmra.mrb[2].mxu0 %v905_v27  ;;  %883 = vmatprep.subr.bf16.mxu1 %v1010_v49 }
  0x7f   :  { %885 = vmatpush3.bf16.msra.mxu1 %v884_v52 }
 0x12f   :  { %v628_v53 = vpop.f32.mrb[0].mxu0 }
 0x130   :  { %v629_v55 = vpop.f32.mrb[1].mxu0 }
 0x131   :  { %v663_v56 = vpop.f32.mrb[0].mxu1  ;;  %v630_v57 = vadd.f32 %v629_v55, %v628_v53 }
 0x132   :  { %v664_v58 = vpop.f32.mrb[1].mxu1 }
 0x133   :  { %v665_v59 = vadd.f32 %v664_v58, %v663_v56  ;;  %v266_v60 = vadd.f32 %v630_v57, %v593_v54 }
 0x135   :  { %v336_v61 = vadd.f32 %v665_v59, %v266_v60  ;;  %v475_v62 = vpop.f32.mrb[2].mxu1 }
 0x136   :  { %v727_v63 = vpop.f32.mrb[3].mxu1 }
 0x14f   :  { %v698_v0 = vpop.f32.mrb[2].mxu0 }
 0x150   :  { %v699_v49 = vpop.f32.mrb[3].mxu0 }
 0x151   :  { %v700_v1 = vadd.f32 %v699_v49, %v698_v0 }
 0x153   :  { %v406_v2 = vadd.f32 %v700_v1, %v336_v61 }
 0x155   :  { %v476_v3 = vadd.f32 %v475_v62, %v406_v2 }
 0x157   :  { %v479_v4 = vmax.f32 %v476_v3, 0.0 }
 0x159   :  { %761 = vmatmul.mubr.f32.vlgmr.msra.gmra.mrb[4].mxu1 %v479_v4 }
 0x22c   :  { %v569_v6 = vpop.f32.mrb[4].mxu1 }
 0x22d   :  { %v570_v7 = vadd.f32 %v595_v5, %v569_v6  ;;  %v762_v8 = vpop.f32.mrb[5].mxu1 }
 0x22f   :  { %v573_v9 = vmax.f32 %v570_v7, 0.0 }
 0x231   :  { %574 = vst [vmem:[#allocation8] sm:$0xff] %v573_v9 }
 0x232   :  { %579 = vsyncadd [#allocation4], 64  ;;  %s1013_s2 = smov [#allocation8]  }
 0x233   :  { %s580_s10 = sshll.u32 %s1013_s2, 4  ;;  %s581_s10 = int_to_ptr.vmem [resolvable:$true] %s580_s10 }
 0x234   :  { %s975_s11 = scalar_lea.vmem %s581_s10, 64  ;;  %s979_s12 = scalar_lea.vmem %s581_s10, 128 }
 0x235   :  { %p976_p10 = scmp.ne.s32.totalorder %s581_s10, %s975_s11  ;;  %p980_p11 = scmp.lt.s32.totalorder %s581_s10, %s581_s10 }
 0x236   :  { %p981_p12 = scmp.lt.s32.totalorder %s979_s12, %s975_s11 }
 0x238   :  { %p982_p13 = por %p981_p12, %p980_p11 }
 0x23a   :  { %p983_p0 = pnand %p982_p13, %p976_p10 }
 0x23c   :  { %986 = shalt.err (!%p983_p0)
}
 0x23d   :  { %s987_s4 = scalar_lea.hbm %s1122_s5, 64 }
 0x23e   :  { %p988_p1 = scmp.ne.s32.totalorder %s1122_s5, %s987_s4  ;;  %p991_p2 = scmp.lt.u32.totalorder %s987_s4, %s1122_s5 }
 0x240   :  { %p993_p3 = pnand %p991_p2, %p988_p1 }
 0x242   :  { %996 = shalt.err (!%p993_p3)
}
 0x243   :  { %s1014_s18 = smov 64   ;;  %s1015_s19 = smov 4  }
 0x244   :  { %586 = dma.vmem_to_hbm [thread:$0]  %s581_s10, 64, %s1122_s5, [#allocation4], %s1014_s18, %s1014_s18, %s1015_s19  }
 0x245   :  { %1001 = dma.done.wait [#allocation4], 128  }
 0x246   :  { %1002 = vsyncadd [#allocation4], 4294967168 }
 0x247   :  { %590 = vsyncpa [#allocation3], 1 }
 0x248   :  { %591 = vsyncpa [#allocation6], 1 }
 0x249   :  { %592 = vsyncpa [#allocation4], 1 }

</bundles_post_ra>
